<compile_context>
chip_gen: v7x
topology: tpu7x:2x2x1
jax: 0.10.0
libtpu: 0.0.40
codegen_flags: <defaults>
</compile_context>

<pallas_src>
import jax
import jax.numpy as jnp
from jax.experimental import pallas as pl
from jax.experimental.pallas import tpu as pltpu


def _round_up(x, m):
    return ((x + m - 1) // m) * m


def _vmem_limit_bytes():
    # Raise the scoped-VMEM cap on 128 MiB chips (v5e/v6e); stay conservative
    # (48 MiB) if the query fails, which is safe on v7x's 64 MiB per-TC VMEM.
    try:
        cap = int(pltpu.get_tpu_info().vmem_capacity_bytes)
    except Exception:
        cap = 64 * 1024 * 1024
    return min(int(cap * 0.75), 100 * 1024 * 1024)


# ---------------------------------------------------------------------------
# Kernels
# ---------------------------------------------------------------------------

def _linear_kernel_resident(x_ref, w_ref, b_ref, o_ref):
    # x:[tm, D] (cast in-kernel) @ w:[D, c_pad] + bias -> o:[tm, c_pad].
    # Weight/bias block indices are constant across the grid -> VMEM-resident.
    acc = jnp.dot(x_ref[...].astype(w_ref.dtype), w_ref[...],
                  preferred_element_type=jnp.float32)
    o_ref[...] = (acc + b_ref[...]).astype(o_ref.dtype)


def _linear_kernel_ktiled_f32out(x_ref, w_ref, b_ref, o_ref):
    # f32 output: accumulate directly into the (k-resident) output block.
    k = pl.program_id(1)

    @pl.when(k == 0)
    def _():
        o_ref[...] = jnp.broadcast_to(b_ref[...], o_ref.shape)

    o_ref[...] += jnp.dot(x_ref[...].astype(w_ref.dtype), w_ref[...],
                          preferred_element_type=jnp.float32)


def _linear_kernel_ktiled_acc(x_ref, w_ref, b_ref, o_ref, acc_ref):
    # Narrow output dtype: f32 accumulator scratch, single cast+store epilogue.
    k = pl.program_id(1)

    @pl.when(k == 0)
    def _():
        acc_ref[...] = jnp.broadcast_to(b_ref[...], acc_ref.shape)

    acc_ref[...] += jnp.dot(x_ref[...].astype(w_ref.dtype), w_ref[...],
                            preferred_element_type=jnp.float32)

    @pl.when(k == pl.num_programs(1) - 1)
    def _():
        o_ref[...] = acc_ref[...].astype(o_ref.dtype)


# ---------------------------------------------------------------------------
# Module wrapper (one-time parameter prep at init, cheap per-call dispatch)
# ---------------------------------------------------------------------------

class LinearClassifierTPU:
    """Pallas TPU equivalent of nn.Linear(out_dim, num_classes)."""

    # Keep the resident weight block well inside v7x's 64 MiB VMEM.
    _RESIDENT_WEIGHT_BYTES = 8 * 1024 * 1024

    def __init__(self, weight, bias, *, compute_dtype=jnp.float32,
                 block_m=512, block_k=512):
        C, D = weight.shape
        self.num_classes = C
        self.out_dim = D
        self.compute_dtype = jnp.dtype(compute_dtype)
        self.block_m = block_m
        # bf16 packs two rows per sublane -> align batch tiles to 16.
        self._align = 16 if self.compute_dtype == jnp.bfloat16 else 8

        c_pad = _round_up(C, 128)  # lane-dense stores, full MXU columns
        self.c_pad = c_pad

        # One-time prep: transpose to [D, C], pad class dim, cast.
        w = jnp.asarray(weight).T.astype(self.compute_dtype)      # [D, C]
        w = jnp.pad(w, ((0, 0), (0, c_pad - C)))                  # [D, c_pad]
        b2d = jnp.pad(jnp.asarray(bias).astype(jnp.float32),
                      (0, c_pad - C)).reshape(1, c_pad)

        w_bytes = D * c_pad * self.compute_dtype.itemsize
        self.use_k_tiling = w_bytes > self._RESIDENT_WEIGHT_BYTES
        if self.use_k_tiling:
            tk = min(block_k, _round_up(D, 128))
            tk = _round_up(tk, 128)
            k_pad = _round_up(D, tk)
            w = jnp.pad(w, ((0, k_pad - D), (0, 0)))
            self.tk, self.k_pad = tk, k_pad
        else:
            self.tk, self.k_pad = None, D
        # TODO(synk): for vocab-sized heads (huge C) add a class-dim grid axis
        # so per-step VMEM stays bounded on v7x.

        self.w = w
        self.b2d = b2d

    # -- per-call ----------------------------------------------------------

    def _pick_tm(self, B):
        align = self._align
        b_aligned = _round_up(B, align)
        tm = min(self.block_m, b_aligned)
        # v7x has 2 TensorCores: prefer >= 2 batch tiles on the "parallel"
        # axis when B allows (harmless on 1-TC chips).
        if b_aligned <= tm and b_aligned >= 2 * align:
            tm = _round_up(b_aligned // 2, align)
        return tm

    def __call__(self, features):
        B, D = features.shape
        assert D == self.out_dim, "feature dim mismatch"
        out_dtype = features.dtype

        tm = self._pick_tm(B)
        b_pad = _round_up(B, tm)

        x = features
        if self.use_k_tiling:
            if b_pad != B or self.k_pad != D:
                x = jnp.pad(x, ((0, b_pad - B), (0, self.k_pad - D)))
            out = self._call_ktiled(x, tm, b_pad, out_dtype)
        else:
            if b_pad != B:
                x = jnp.pad(x, ((0, b_pad - B), (0, 0)))
            out = self._call_resident(x, tm, b_pad, out_dtype)

        return out[:B, :self.num_classes]

    def _call_resident(self, x, tm, b_pad, out_dtype):
        D, c_pad = self.out_dim, self.c_pad
        return pl.pallas_call(
            _linear_kernel_resident,
            out_shape=jax.ShapeDtypeStruct((b_pad, c_pad), out_dtype),
            grid_spec=pltpu.PrefetchScalarGridSpec(
                num_scalar_prefetch=0,
                grid=(b_pad // tm,),
                in_specs=[
                    pl.BlockSpec((tm, D), lambda i: (i, 0)),      # x tile
                    pl.BlockSpec((D, c_pad), lambda i: (0, 0)),   # weight (resident)
                    pl.BlockSpec((1, c_pad), lambda i: (0, 0)),   # bias (resident)
                ],
                out_specs=pl.BlockSpec((tm, c_pad), lambda i: (i, 0)),
            ),
            compiler_params=pltpu.CompilerParams(
                dimension_semantics=("parallel",),
                vmem_limit_bytes=_vmem_limit_bytes(),
            ),
        )(x, self.w, self.b2d)

    def _call_ktiled(self, x, tm, b_pad, out_dtype):
        c_pad, k_pad, tk = self.c_pad, self.k_pad, self.tk
        f32_out = jnp.dtype(out_dtype) == jnp.float32
        kernel = _linear_kernel_ktiled_f32out if f32_out else _linear_kernel_ktiled_acc
        scratch = [] if f32_out else [pltpu.VMEM((tm, c_pad), jnp.float32)]
        return pl.pallas_call(
            kernel,
            out_shape=jax.ShapeDtypeStruct((b_pad, c_pad), out_dtype),
            grid_spec=pltpu.PrefetchScalarGridSpec(
                num_scalar_prefetch=0,
                grid=(b_pad // tm, k_pad // tk),
                in_specs=[
                    pl.BlockSpec((tm, tk), lambda i, k: (i, k)),     # x tile
                    pl.BlockSpec((tk, c_pad), lambda i, k: (k, 0)),  # weight tile
                    pl.BlockSpec((1, c_pad), lambda i, k: (0, 0)),   # bias
                ],
                out_specs=pl.BlockSpec((tm, c_pad), lambda i, k: (i, 0)),
                scratch_shapes=scratch,
            ),
            compiler_params=pltpu.CompilerParams(
                dimension_semantics=("parallel", "arbitrary"),
                vmem_limit_bytes=_vmem_limit_bytes(),
            ),
        )(x, self.w, self.b2d)


if __name__ == "__main__":
    # LinearClassifier(num_classes=10, out_dim=512), batch=8.
    B, D, C = 8, 512, 10

    key = jax.random.PRNGKey(0)
    k_x, k_w, k_b = jax.random.split(key, 3)

    features = jax.random.normal(k_x, (B, D), dtype=jnp.float32)
    # Mimic nn.Linear's uniform(-1/sqrt(D), 1/sqrt(D)) init.
    bound = 1.0 / jnp.sqrt(jnp.float32(D))
    weight = jax.random.uniform(k_w, (C, D), minval=-bound, maxval=bound,
                                dtype=jnp.float32)
    bias = jax.random.uniform(k_b, (C,), minval=-bound, maxval=bound,
                              dtype=jnp.float32)

    ref = features @ weight.T + bias

    # f32 path (exact semantics of the torch module).
    clf_f32 = LinearClassifierTPU(weight, bias, compute_dtype=jnp.float32)
    out = jax.block_until_ready(jax.jit(clf_f32.__call__)(features))
    assert out.shape == (B, C)
    assert jnp.allclose(out, ref, atol=1e-5, rtol=1e-5), "f32 mismatch vs reference"

    # bf16 weights + in-kernel activation cast, f32 accumulation (MXU path).
    clf_bf16 = LinearClassifierTPU(weight, bias, compute_dtype=jnp.bfloat16)
    out_bf16 = jax.block_until_ready(jax.jit(clf_bf16.__call__)(features))
    assert out_bf16.shape == (B, C)
    assert jnp.allclose(out_bf16, ref, atol=2e-2, rtol=2e-2), "bf16 mismatch vs reference"

    print("KERNEL_OK")
</pallas_src>

<mosaic_0001>
module attributes {stable_mosaic.version = 11 : i64} {
  func.func @_linear_kernel_resident(%arg0: i32, %arg1: memref<8x512xf32, #tpu.memory_space<vmem>>, %arg2: memref<512x128xf32, #tpu.memory_space<vmem>>, %arg3: memref<1x128xf32, #tpu.memory_space<vmem>>, %arg4: memref<8x128xf32, #tpu.memory_space<vmem>>) attributes {dimension_semantics = [#tpu.dimension_semantics<parallel>], iteration_bounds = array<i64: 1>, scalar_prefetch = 0 : i64, scratch_operands = 0 : i64, tpu.core_type = #tpu.core_type<tc>, window_params = [{transform_indices = @transform_0, window_bounds = array<i64: 8, 512>}, {pipeline_mode = #tpu.pipeline_mode<synchronous>, transform_indices = @transform_1, window_bounds = array<i64: 512, 128>}, {pipeline_mode = #tpu.pipeline_mode<synchronous>, transform_indices = @transform_2, window_bounds = array<i64: 1, 128>}, {transform_indices = @transform_3, window_bounds = array<i64: 8, 128>}]} {
    %c0 = arith.constant 0 : index
    %c0_0 = arith.constant 0 : index
    %0 = vector.load %arg1[%c0, %c0_0] : memref<8x512xf32, #tpu.memory_space<vmem>>, vector<8x512xf32>
    %c0_1 = arith.constant 0 : index
    %c0_2 = arith.constant 0 : index
    %1 = vector.load %arg2[%c0_1, %c0_2] : memref<512x128xf32, #tpu.memory_space<vmem>>, vector<512x128xf32>
    %cst = arith.constant dense<0.000000e+00> : vector<8x128xf32>
    %2 = tpu.matmul %0, %1, %cst {dimension_numbers = #tpu.dot_dimension_numbers<[1], [0], [0], [1], [0, 0, 1, 1], [], []>} : vector<8x512xf32>, vector<512x128xf32>, vector<8x128xf32> -> vector<8x128xf32>
    %c0_3 = arith.constant 0 : index
    %c0_4 = arith.constant 0 : index
    %3 = vector.load %arg3[%c0_3, %c0_4] : memref<1x128xf32, #tpu.memory_space<vmem>>, vector<1x128xf32>
    %4 = vector.broadcast %3 : vector<1x128xf32> to vector<8x128xf32>
    %5 = arith.addf %2, %4 : vector<8x128xf32>
    %c0_5 = arith.constant 0 : index
    %c0_6 = arith.constant 0 : index
    %6 = vector.load %arg4[%c0_5, %c0_6] : memref<8x128xf32, #tpu.memory_space<vmem>>, vector<8x128xf32>
    tpu.vector_store %arg4[%c0_5, %c0_6], %5 {strides = array<i32>} : memref<8x128xf32, #tpu.memory_space<vmem>>, vector<8x128xf32>,
    return
  }
  func.func @transform_0(%arg0: i32) -> (i32, i32) {
    %c0_i32 = arith.constant 0 : i32
    %c0_i32_0 = arith.constant 0 : i32
    return %arg0, %c0_i32 : i32, i32
  }
  func.func @transform_1(%arg0: i32) -> (i32, i32) {
    %c0_i32 = arith.constant 0 : i32
    %c0_i32_0 = arith.constant 0 : i32
    %c0_i32_1 = arith.constant 0 : i32
    return %c0_i32, %c0_i32_0 : i32, i32
  }
  func.func @transform_2(%arg0: i32) -> (i32, i32) {
    %c0_i32 = arith.constant 0 : i32
    %c0_i32_0 = arith.constant 0 : i32
    %c0_i32_1 = arith.constant 0 : i32
    return %c0_i32, %c0_i32_0 : i32, i32
  }
  func.func @transform_3(%arg0: i32) -> (i32, i32) {
    %c0_i32 = arith.constant 0 : i32
    %c0_i32_0 = arith.constant 0 : i32
    return %arg0, %c0_i32 : i32, i32
  }
}

</mosaic_0001>

<bundles_post_ra>
// kernel: a_call__.1
= control target key start
LH: loop header
LB: loop body
LE: loop exit
PB: predicated region body
PF: predicated region fallthrough
CT: control target
= control target key end

     0   :  { %8 = vsyncpa [#allocation3], 0  ;;  %s556_s0 = inlined_call_operand.hbm [shape: f32[8,512], index: 0, kind: input, shape index: {}]   ;;  %s557_s1 = inlined_call_operand.hbm [shape: f32[512,128], index: 1, kind: input, shape index: {}]   ;;  %s558_s2 = inlined_call_operand.vmem [shape: f32[1,128], index: 2, kind: input, shape index: {}]   ;;  %s559_s3 = inlined_call_operand.hbm [shape: f32[8,128], index: 3, kind: output, shape index: {}]  }
   0x1   :  { %9 = vsyncpa [#allocation6], 0 }
   0x2   :  { %10 = vsyncpa [#allocation4], 0  ;;  %s485_s12 = smov [#allocation2]   ;;  %s486_s14 = smov [#allocation5]  }
   0x3   :  { %s17_s13 = sshll.u32 %s485_s12, 4  ;;  %s26_s15 = sshll.u32 %s486_s14, 4  ;;  %s18_s13 = int_to_ptr.vmem [resolvable:$true] %s17_s13  ;;  %s510_s15 = int_to_ptr.vmem [resolvable:$true] %s26_s15 }
   0x4   :  { %s413_s18 = scalar_lea.hbm %s556_s0, 512 }
   0x5   :  { %p414_p0 = scmp.ne.s32.totalorder %s556_s0, %s413_s18  ;;  %p417_p1 = scmp.lt.u32.totalorder %s413_s18, %s556_s0 }
   0x7   :  { %p419_p2 = pnand %p417_p1, %p414_p0 }
   0x9   :  { %422 = shalt.err (!%p419_p2)
}
   0xa   :  { %s423_s23 = scalar_lea.vmem %s18_s13, 512  ;;  %p428_p4 = scmp.lt.s32.totalorder %s18_s13, %s18_s13 }
   0xb   :  { %p424_p3 = scmp.ne.s32.totalorder %s18_s13, %s423_s23  ;;  %p429_p5 = scmp.lt.s32.totalorder %s423_s23, %s423_s23 }
   0xd   :  { %p430_p6 = por %p429_p5, %p428_p4 }
   0xf   :  { %p431_p7 = pnand %p430_p6, %p424_p3 }
  0x11   :  { %434 = shalt.err (!%p431_p7)
}
  0x12   :  { %20 = dma.hbm_to_vmem [thread:$0]  %s556_s0, 512, %s18_s13, [#allocation3]  }
  0x13   :  { %s435_s28 = scalar_lea.hbm %s557_s1, 8192 }
  0x14   :  { %p436_p8 = scmp.ne.s32.totalorder %s557_s1, %s435_s28  ;;  %p439_p9 = scmp.lt.u32.totalorder %s435_s28, %s557_s1 }
  0x16   :  { %p441_p10 = pnand %p439_p9, %p436_p8 }
  0x18   :  { %444 = shalt.err (!%p441_p10)
}
  0x19   :  { %s445_s6 = scalar_lea.vmem %s510_s15, 8192  ;;  %p450_p12 = scmp.lt.s32.totalorder %s510_s15, %s510_s15 }
  0x1a   :  { %p446_p11 = scmp.ne.s32.totalorder %s510_s15, %s445_s6  ;;  %p451_p13 = scmp.lt.s32.totalorder %s445_s6, %s445_s6 }
  0x1c   :  { %p452_p0 = por %p451_p13, %p450_p12 }
  0x1e   :  { %p453_p1 = pnand %p452_p0, %p446_p11 }
  0x20   :  { %456 = shalt.err (!%p453_p1)
}
  0x21   :  { %s487_s0 = smov 128   ;;  %s488_s7 = smov 8  }
  0x22   :  { %32 = dma.hbm_to_vmem [thread:$0]  %s557_s1, 8192, %s510_s15, [#allocation6], %s487_s0, %s487_s0, %s488_s7  }
  0x23   :  { %479 = dma.done.wait [#allocation3], 512  }
  0x24   :  { %480 = vsyncadd [#allocation3], 4294966784 }
  0x25   :  { %481 = dma.done.wait [#allocation6], 8192  }
  0x26   :  { %482 = vsyncadd [#allocation6], 4294959104  ;;  %v61_v0 = vld [vmem:[#allocation5 + $0x80] sm:$0xff]  ;;  %v62_v1 = vld [vmem:[#allocation5 + $0x88] sm:$0xff]  ;;  %s489_s11 = smov [#allocation7]  }
  0x27   :  { %v45_v2 = vld [vmem:[#allocation5] sm:$0xff]  ;;  %v344_v3 = vpack.c.bf16 %v62_v1, %v61_v0  ;;  %v46_v4 = vld [vmem:[#allocation5 + $0x8] sm:$0xff]  ;;  %v63_v11 = vld [vmem:[#allocation5 + $0x90] sm:$0xff]  ;;  %s263_s12 = sshll.u32 %s489_s11, 4  ;;  %s264_s12 = int_to_ptr.vmem [resolvable:$true] %s263_s12 }
  0x28   :  { %v93_v5 = vld [vmem:[#allocation5 + $0x180] sm:$0xff]  ;;  %v94_v6 = vld [vmem:[#allocation5 + $0x188] sm:$0xff]  ;;  %v346_v7 = vpack.c.bf16 %v46_v4, %v45_v2  ;;  %v64_v13 = vld [vmem:[#allocation5 + $0x98] sm:$0xff]  ;;  %s457_s13 = scalar_lea.vmem %s264_s12, 128  ;;  %p462_p3 = scmp.lt.s32.totalorder %s264_s12, %s264_s12 }
  0x29   :  { %v376_v8 = vpack.c.bf16 %v94_v6, %v93_v5  ;;  %v77_v9 = vld [vmem:[#allocation5 + $0x100] sm:$0xff]  ;;  %v78_v10 = vld [vmem:[#allocation5 + $0x108] sm:$0xff]  ;;  %345 = vmatprep.subr.bf16.mxu0 %v344_v3  ;;  %v47_v14 = vld [vmem:[#allocation5 + $0x10] sm:$0xff]  ;;  %v348_v16 = vpack.c.bf16 %v64_v13, %v63_v11  ;;  %p458_p2 = scmp.ne.s32.totalorder %s264_s12, %s457_s13  ;;  %p463_p4 = scmp.lt.s32.totalorder %s457_s13, %s457_s13 }
  0x2a   :  { %v378_v12 = vpack.c.bf16 %v78_v10, %v77_v9  ;;  %v48_v15 = vld [vmem:[#allocation5 + $0x18] sm:$0xff]  ;;  %347 = vmatpush3.bf16.msra.mxu0 %v346_v7  ;;  %v95_v18 = vld [vmem:[#allocation5 + $0x190] sm:$0xff]  ;;  %v65_v23 = vld [vmem:[#allocation5 + $0xa0] sm:$0xff] }
  0x2b   :  { %377 = vmatprep.subr.bf16.mxu1 %v376_v8  ;;  %v350_v17 = vpack.c.bf16 %v48_v15, %v47_v14  ;;  %v96_v19 = vld [vmem:[#allocation5 + $0x198] sm:$0xff]  ;;  %v79_v20 = vld [vmem:[#allocation5 + $0x110] sm:$0xff]  ;;  %v66_v24 = vld [vmem:[#allocation5 + $0xa8] sm:$0xff]  ;;  %349 = vmatprep.subr.bf16.mxu0 %v348_v16  ;;  %p464_p5 = por %p463_p4, %p462_p3 }
  0x2c   :  { %379 = vmatpush3.bf16.msra.mxu1 %v378_v12  ;;  %v380_v21 = vpack.c.bf16 %v96_v19, %v95_v18  ;;  %v80_v22 = vld [vmem:[#allocation5 + $0x118] sm:$0xff]  ;;  %v352_v26 = vpack.c.bf16 %v66_v24, %v65_v23  ;;  %v49_v27 = vld [vmem:[#allocation5 + $0x20] sm:$0xff]  ;;  %v50_v28 = vld [vmem:[#allocation5 + $0x28] sm:$0xff] }
  0x2d   :  { %v382_v25 = vpack.c.bf16 %v80_v22, %v79_v20  ;;  %v97_v29 = vld [vmem:[#allocation5 + $0x1a0] sm:$0xff]  ;;  %v98_v30 = vld [vmem:[#allocation5 + $0x1a8] sm:$0xff]  ;;  %v354_v33 = vpack.c.bf16 %v50_v28, %v49_v27  ;;  %v67_v35 = vld [vmem:[#allocation5 + $0xb0] sm:$0xff]  ;;  %p465_p6 = pnand %p464_p5, %p458_p2 }
  0x2e   :  { %381 = vmatprep.subr.bf16.mxu1 %v380_v21  ;;  %v81_v31 = vld [vmem:[#allocation5 + $0x120] sm:$0xff]  ;;  %v82_v32 = vld [vmem:[#allocation5 + $0x128] sm:$0xff]  ;;  %351 = vmatpush3.bf16.msra.mxu0 %v350_v17  ;;  %v384_v34 = vpack.c.bf16 %v98_v30, %v97_v29  ;;  %v68_v36 = vld [vmem:[#allocation5 + $0xb8] sm:$0xff] }
  0x2f   :  { %v51_v37 = vld [vmem:[#allocation5 + $0x30] sm:$0xff]  ;;  %353 = vmatprep.subr.bf16.mxu0 %v352_v26  ;;  %v386_v38 = vpack.c.bf16 %v82_v32, %v81_v31  ;;  %v356_v39 = vpack.c.bf16 %v68_v36, %v67_v35  ;;  %v52_v40 = vld [vmem:[#allocation5 + $0x38] sm:$0xff]  ;;  %v69_v46 = vld [vmem:[#allocation5 + $0xc0] sm:$0xff] }
  0x30   :  { %383 = vmatpush3.bf16.msra.mxu1 %v382_v25  ;;  %v99_v41 = vld [vmem:[#allocation5 + $0x1b0] sm:$0xff]  ;;  %v100_v42 = vld [vmem:[#allocation5 + $0x1b8] sm:$0xff]  ;;  %v70_v47 = vld [vmem:[#allocation5 + $0xc8] sm:$0xff]  ;;  %v358_v48 = vpack.c.bf16 %v52_v40, %v51_v37 }
  0x31   :  { %385 = vmatprep.subr.bf16.mxu1 %v384_v34  ;;  %v388_v43 = vpack.c.bf16 %v100_v42, %v99_v41  ;;  %v83_v44 = vld [vmem:[#allocation5 + $0x130] sm:$0xff]  ;;  %v84_v45 = vld [vmem:[#allocation5 + $0x138] sm:$0xff]  ;;  %v101_v49 = vld [vmem:[#allocation5 + $0x1c0] sm:$0xff]  ;;  %v360_v52 = vpack.c.bf16 %v70_v47, %v69_v46 }
  0x32   :  { %355 = vmatpush3.bf16.msra.mxu0 %v354_v33  ;;  %v102_v50 = vld [vmem:[#allocation5 + $0x1c8] sm:$0xff]  ;;  %v390_v51 = vpack.c.bf16 %v84_v45, %v83_v44  ;;  %v53_v53 = vld [vmem:[#allocation5 + $0x40] sm:$0xff]  ;;  %v71_v58 = vld [vmem:[#allocation5 + $0xd0] sm:$0xff] }
  0x33   :  { %357 = vmatprep.subr.bf16.mxu0 %v356_v39  ;;  %v54_v54 = vld [vmem:[#allocation5 + $0x48] sm:$0xff]  ;;  %v85_v55 = vld [vmem:[#allocation5 + $0x140] sm:$0xff]  ;;  %v392_v56 = vpack.c.bf16 %v102_v50, %v101_v49  ;;  %v72_v59 = vld [vmem:[#allocation5 + $0xd8] sm:$0xff] }
  0x34   :  { %387 = vmatpush3.bf16.msra.mxu1 %v386_v38  ;;  %v86_v57 = vld [vmem:[#allocation5 + $0x148] sm:$0xff]  ;;  %v103_v60 = vld [vmem:[#allocation5 + $0x1d0] sm:$0xff]  ;;  %v104_v61 = vld [vmem:[#allocation5 + $0x1d8] sm:$0xff]  ;;  %v362_v62 = vpack.c.bf16 %v54_v54, %v53_v53  ;;  %v364_v0 = vpack.c.bf16 %v72_v59, %v71_v58 }
  0x35   :  { %389 = vmatprep.subr.bf16.mxu1 %v388_v43  ;;  %v394_v63 = vpack.c.bf16 %v86_v57, %v85_v55  ;;  %v55_v1 = vld [vmem:[#allocation5 + $0x50] sm:$0xff]  ;;  %v56_v2 = vld [vmem:[#allocation5 + $0x58] sm:$0xff]  ;;  %v396_v4 = vpack.c.bf16 %v104_v61, %v103_v60  ;;  %v73_v6 = vld [vmem:[#allocation5 + $0xe0] sm:$0xff] }
  0x36   :  { %359 = vmatpush3.bf16.msra.mxu0 %v358_v48  ;;  %v87_v3 = vld [vmem:[#allocation5 + $0x150] sm:$0xff]  ;;  %v88_v5 = vld [vmem:[#allocation5 + $0x158] sm:$0xff]  ;;  %v74_v7 = vld [vmem:[#allocation5 + $0xe8] sm:$0xff]  ;;  %v366_v10 = vpack.c.bf16 %v56_v2, %v55_v1 }
  0x37   :  { %361 = vmatprep.subr.bf16.mxu0 %v360_v52  ;;  %v105_v8 = vld [vmem:[#allocation5 + $0x1e0] sm:$0xff]  ;;  %v106_v9 = vld [vmem:[#allocation5 + $0x1e8] sm:$0xff]  ;;  %v398_v13 = vpack.c.bf16 %v88_v5, %v87_v3  ;;  %v368_v14 = vpack.c.bf16 %v74_v7, %v73_v6  ;;  %v75_v19 = vld [vmem:[#allocation5 + $0xf0] sm:$0xff] }
  0x38   :  { %391 = vmatpush3.bf16.msra.mxu1 %v390_v51  ;;  %v57_v11 = vld [vmem:[#allocation5 + $0x60] sm:$0xff]  ;;  %v58_v12 = vld [vmem:[#allocation5 + $0x68] sm:$0xff]  ;;  %v400_v18 = vpack.c.bf16 %v106_v9, %v105_v8  ;;  %v76_v20 = vld [vmem:[#allocation5 + $0xf8] sm:$0xff] }
  0x39   :  { %393 = vmatprep.subr.bf16.mxu1 %v392_v56  ;;  %v89_v15 = vld [vmem:[#allocation5 + $0x160] sm:$0xff]  ;;  %v90_v16 = vld [vmem:[#allocation5 + $0x168] sm:$0xff]  ;;  %v44_v21 = vld [vmem:[#allocation2 + $0x18] sm:$0xff]  ;;  %v370_v24 = vpack.c.bf16 %v58_v12, %v57_v11  ;;  %v372_v26 = vpack.c.bf16 %v76_v20, %v75_v19 }
  0x3a   :  { %363 = vmatpush3.bf16.msra.mxu0 %v362_v62  ;;  %v42_v17 = vld [vmem:[#allocation2 + $0x8] sm:$0xff]  ;;  %v107_v22 = vld [vmem:[#allocation5 + $0x1f0] sm:$0xff]  ;;  %v108_v23 = vld [vmem:[#allocation5 + $0x1f8] sm:$0xff]  ;;  %250 = vmatprep.mubr.f32.mxu1 %v44_v21  ;;  %v402_v25 = vpack.c.bf16 %v90_v16, %v89_v15 }
  0x3b   :  { %365 = vmatprep.subr.bf16.mxu0 %v364_v0  ;;  %180 = vmatprep.mubr.f32.mxu0 %v42_v17  ;;  %v59_v27 = vld [vmem:[#allocation5 + $0x70] sm:$0xff]  ;;  %v60_v28 = vld [vmem:[#allocation5 + $0x78] sm:$0xff]  ;;  %v404_v29 = vpack.c.bf16 %v108_v23, %v107_v22  ;;  %v41_v34 = vld [vmem:[#allocation2] sm:$0xff] }
  0x3c   :  { %395 = vmatpush3.bf16.msra.mxu1 %v394_v63  ;;  %v91_v30 = vld [vmem:[#allocation5 + $0x170] sm:$0xff]  ;;  %v92_v31 = vld [vmem:[#allocation5 + $0x178] sm:$0xff]  ;;  %v374_v32 = vpack.c.bf16 %v60_v28, %v59_v27  ;;  %v273_v37 = vld [vmem:[%s558_s2] ss:$0 sm:$0xff] }
  0x3d   :  { %397 = vmatprep.subr.bf16.mxu1 %v396_v4  ;;  %v406_v33 = vpack.c.bf16 %v92_v31, %v91_v30  ;;  %v43_v35 = vld [vmem:[#allocation2 + $0x10] sm:$0xff] }
  0x3e   :  { %367 = vmatpush3.bf16.msra.mxu0 %v366_v10 }
  0x3f   :  { %369 = vmatprep.subr.bf16.mxu0 %v368_v14 }
  0x40   :  { %399 = vmatpush3.bf16.msra.mxu1 %v398_v13 }
  0x41   :  { %401 = vmatprep.subr.bf16.mxu1 %v400_v18 }
  0x42   :  { %371 = vmatpush3.bf16.msra.mxu0 %v370_v24 }
  0x43   :  { %373 = vmatprep.subr.bf16.mxu0 %v372_v26 }
  0x44   :  { %403 = vmatpush3.bf16.msra.mxu1 %v402_v25 }
  0x45   :  { %405 = vmatprep.subr.bf16.mxu1 %v404_v29 }
  0x46   :  { %375 = vmatpush3.bf16.msra.mxu0 %v374_v32 }
  0x48   :  { %407 = vmatpush3.bf16.msra.mxu1 %v406_v33 }
  0x49   :  { %181 = vmatmul.mubr.f32.vlgmr.msra.gmra.mrb[0].mxu0 %v41_v34 }
  0x4b   :  { %251 = vmatmul.mubr.f32.vlgmr.msra.gmra.mrb[0].mxu1 %v43_v35 }
 0x11c   :  { %v306_v36 = vpop.f32.mrb[0].mxu0 }
 0x11d   :  { %v307_v38 = vpop.f32.mrb[1].mxu0 }
 0x11e   :  { %v341_v39 = vpop.f32.mrb[0].mxu1  ;;  %v308_v40 = vadd.f32 %v307_v38, %v306_v36 }
 0x11f   :  { %v342_v41 = vpop.f32.mrb[1].mxu1 }
 0x120   :  { %v343_v42 = vadd.f32 %v342_v41, %v341_v39  ;;  %v183_v43 = vadd.f32 %v308_v40, %v273_v37 }
 0x122   :  { %v253_v44 = vadd.f32 %v343_v42, %v183_v43 }
 0x124   :  { %256 = vst [vmem:[#allocation7] sm:$0xff] %v253_v44 }
 0x125   :  { %468 = shalt.err (!%p465_p6)
}
 0x126   :  { %s469_s15 = scalar_lea.hbm %s559_s3, 128 }
 0x127   :  { %p470_p7 = scmp.ne.s32.totalorder %s559_s3, %s469_s15  ;;  %p473_p8 = scmp.lt.u32.totalorder %s469_s15, %s559_s3 }
 0x129   :  { %p475_p9 = pnand %p473_p8, %p470_p7 }
 0x12b   :  { %478 = shalt.err (!%p475_p9)
}
 0x12c   :  { %266 = dma.vmem_to_hbm [thread:$0]  %s264_s12, 128, %s559_s3, [#allocation4]  }
 0x12d   :  { %483 = dma.done.wait [#allocation4], 128  }
 0x12e   :  { %484 = vsyncadd [#allocation4], 4294967168 }
 0x12f   :  { %270 = vsyncpa [#allocation3], 1 }
 0x130   :  { %271 = vsyncpa [#allocation6], 1 }
 0x131   :  { %272 = vsyncpa [#allocation4], 1 }

</bundles_post_ra>
